<compile_context>
chip_gen: v7x
topology: tpu7x:2x2x1
jax: 0.10.0
libtpu: 0.0.40
codegen_flags: <defaults>
</compile_context>

<pallas_src>
import jax
import jax.numpy as jnp
from jax import lax
from jax.experimental import pallas as pl
from jax.experimental.pallas import tpu as pltpu

EPS = 1e-5  # eps used by both BatchNorm1d and LayerNorm defaults in PyTorch


# ---------------------------------------------------------------------------
# Generation-aware VMEM sizing (128 MiB on v5e/v6e, 64 MiB/TC on v7x).
# ---------------------------------------------------------------------------
def _vmem_budget():
    cap = 64 * 1024 * 1024  # conservative fallback = v7x per-core VMEM
    try:
        cap = int(pltpu.get_tpu_info().vmem_capacity_bytes)
    except Exception:
        pass
    cap = max(cap, 32 * 1024 * 1024)
    limit = min((3 * cap) // 4, 100 * 1024 * 1024)  # scoped VMEM limit
    budget = (3 * limit) // 4                       # budget for pipelined data tiles
    return int(limit), int(budget)


def _choose_row_tile(n_rows, feat, hidden, mm_bytes, store_bytes, budget):
    """Row tile for the projection: biggest 8-aligned divisor of n_rows that
    fits the budget (preferring 512/256/128 multiples for full MXU passes)."""
    resident = 2 * feat * (2 * hidden) * mm_bytes            # W.T (double-buffered)
    per_row = 2 * feat * mm_bytes + 4 * hidden * store_bytes  # x + wa + wz tiles, dbuf
    avail = max(budget - resident, 1 << 20)
    cap = int(min(max(avail // per_row, 8), 4096))
    if n_rows <= cap:
        return n_rows
    for align in (512, 256, 128, 64, 32, 16, 8):
        t = cap - cap % align
        while t >= align:
            if n_rows % t == 0:
                return t
            t -= align
    # TODO(synk): pathological n_rows with no 8-aligned divisor <= cap; a
    # masked row tiling would be needed to both fit VMEM and tile.
    return n_rows


def _choose_time_chunk(seq_len, batch, hidden, mm_bytes, store_bytes, budget):
    """Time chunk for the recurrence; returns (tc, padded_T).  Prefers a
    divisor of T; otherwise pads T with zeros instead of decaying tc."""
    resident = (4 * hidden * hidden * mm_bytes        # Ua.T / Uz.T, double-buffered
                + batch * hidden * 4                  # h scratch
                + 2 * 4 * hidden * 4)                 # BN params, double-buffered
    per_step = 4 * batch * hidden * store_bytes + 2 * batch * hidden * 4
    avail = max(budget - resident, 1 << 20)
    cap = int(min(max(avail // per_step, 1), 256))
    tc = min(seq_len, cap)
    lo = max(1, tc // 2)
    for c in range(tc, lo - 1, -1):
        if seq_len % c == 0:
            return c, seq_len
    t_pad = ((seq_len + tc - 1) // tc) * tc
    return tc, t_pad


# ---------------------------------------------------------------------------
# Kernel 1: tiled input projection (x @ W.T) + per-tile BatchNorm moments.
# grid = (n_row_tiles,), every tile independent -> "parallel".
# ---------------------------------------------------------------------------
def _make_proj_kernel(hidden, store_dtype):
    def kernel(x_ref, wt_ref, wa_ref, wz_ref, stats_ref):
        # x_ref: (Tm, F)   wt_ref: (F, 2H)
        # wa_ref/wz_ref: (Tm, H)   stats_ref: (1, 2, 2H) = [sum; sum(x^2)]
        wx = jnp.dot(x_ref[...], wt_ref[...], preferred_element_type=jnp.float32)
        wa_ref[...] = wx[:, :hidden].astype(store_dtype)
        wz_ref[...] = wx[:, hidden:].astype(store_dtype)
        s = jnp.sum(wx, axis=0, keepdims=True)            # (1, 2H)
        ss = jnp.sum(wx * wx, axis=0, keepdims=True)      # (1, 2H)
        stats_ref[...] = jnp.concatenate([s, ss], axis=0)[None]  # (1, 2, 2H)

    return kernel


def _finalize_bn(stats, n_true, hidden):
    """Combine per-tile raw moments (zero-padded rows contribute exactly 0) and
    build the lazily-applied BN affine params, laid out per gate: (4, H) =
    [scale_a; shift_a; scale_z; shift_z] with scale=inv_std, shift=mean*inv_std."""
    sums = jnp.sum(stats[:, 0, :], axis=0)
    ssqs = jnp.sum(stats[:, 1, :], axis=0)
    n = jnp.float32(n_true)
    mean = sums / n
    # NOTE: E[x^2]-E[x]^2 in f32; acceptable here because the bias-free
    # projection is ~zero-mean, so cancellation is mild.
    var = jnp.maximum(ssqs / n - mean * mean, 0.0)
    inv_std = lax.rsqrt(var + EPS)
    scale = inv_std
    shift = mean * inv_std
    return jnp.stack(
        [scale[:hidden], shift[:hidden], scale[hidden:], shift[hidden:]], axis=0
    ).astype(jnp.float32)


# ---------------------------------------------------------------------------
# Kernel 2: SLiGRU recurrence, time-chunked.  grid = (time_chunks,), "arbitrary".
# ---------------------------------------------------------------------------
def _make_recurrence_kernel(matmul_dtype, unroll):
    def kernel(wa_ref, wz_ref, uta_ref, utz_ref, bn_ref, o_ref, h_ref):
        # wa_ref/wz_ref: (Tc, B, H)   uta_ref/utz_ref: (H, H) = Ua.T / Uz.T
        # bn_ref: (4, H) BN affine    o_ref: (Tc, B, H)   h_ref: (B, H) carry
        c = pl.program_id(0)

        @pl.when(c == 0)
        def _():
            h_ref[...] = jnp.zeros_like(h_ref)  # h_init = zeros

        bsz, hidden = h_ref.shape
        tc = wa_ref.shape[0]
        inv_g = 1.0 / float(2 * hidden)

        # Hoisted out of the time loop: BN affine broadcasts and U.T loads.
        scale_a = jnp.broadcast_to(bn_ref[0:1, :], (bsz, hidden))
        shift_a = jnp.broadcast_to(bn_ref[1:2, :], (bsz, hidden))
        scale_z = jnp.broadcast_to(bn_ref[2:3, :], (bsz, hidden))
        shift_z = jnp.broadcast_to(bn_ref[3:4, :], (bsz, hidden))
        uta = uta_ref[...]
        utz = utz_ref[...]
        # TODO(synk): pltpu.matmul_push_rhs could keep uta/utz in MXU weight
        # registers across the whole loop; using jnp.dot for portability.

        def step(t, h):
            wa = wa_ref[t].astype(jnp.float32) * scale_a - shift_a   # BN (a-gate)
            wz = wz_ref[t].astype(jnp.float32) * scale_z - shift_z   # BN (z-gate)
            hm = h.astype(matmul_dtype)
            ua = jnp.dot(hm, uta, preferred_element_type=jnp.float32)  # (B, H)
            uz = jnp.dot(hm, utz, preferred_element_type=jnp.float32)  # (B, H)
            # One-pass LayerNorm stats over the concatenated (a, z) gates.
            s = jnp.sum(ua, axis=-1, keepdims=True) + jnp.sum(uz, axis=-1, keepdims=True)
            ss = (jnp.sum(ua * ua, axis=-1, keepdims=True)
                  + jnp.sum(uz * uz, axis=-1, keepdims=True))
            mu = s * inv_g
            var = jnp.maximum(ss * inv_g - mu * mu, 0.0)
            r = lax.rsqrt(var + EPS)
            at = wa + (ua - mu) * r
            zt = jax.nn.sigmoid(wz + (uz - mu) * r)
            hcand = jnp.maximum(at, 0.0)                 # relu
            h_new = hcand + zt * (h - hcand)             # = z*h + (1-z)*hcand
            o_ref[t] = h_new
            return h_new

        h_ref[...] = lax.fori_loop(0, tc, step, h_ref[...], unroll=unroll)

    return kernel


# ---------------------------------------------------------------------------
# One LiGRU_Layer forward (unidirectional, batchnorm, relu).  Time-major I/O.
# ---------------------------------------------------------------------------
def sligru_layer(x_tbf, W, U, *, matmul_dtype=jnp.bfloat16,
                 row_tile=None, time_chunk=None):
    """x_tbf: (T, B, F) f32, W: (2H, F), U: (2H, H).  Returns (T, B, H) f32."""
    T, B, F = x_tbf.shape
    h2 = W.shape[0]
    hidden = h2 // 2
    store_dtype = matmul_dtype                       # wx storage dtype (bf16 default)
    mm_bytes = jnp.dtype(matmul_dtype).itemsize
    store_bytes = jnp.dtype(store_dtype).itemsize

    vmem_limit, budget = _vmem_budget()

    # --- time chunk (pad T with zeros instead of degenerate fallbacks) ---
    if time_chunk is not None:
        tc = max(1, min(int(time_chunk), T))
        t_pad = ((T + tc - 1) // tc) * tc
    else:
        tc, t_pad = _choose_time_chunk(T, B, hidden, mm_bytes, store_bytes, budget)
    if t_pad != T:
        x_tbf = jnp.pad(x_tbf, ((0, t_pad - T), (0, 0), (0, 0)))  # zero rows

    n_rows = t_pad * B
    n_true = T * B                                  # true rows for BN statistics
    x_flat = x_tbf.reshape(n_rows, F).astype(matmul_dtype)  # free row-major reshape
    wt = jnp.transpose(W).astype(matmul_dtype)               # (F, 2H)

    if row_tile is not None and n_rows % int(row_tile) == 0:
        tm = int(row_tile)
    else:
        tm = _choose_row_tile(n_rows, F, hidden, mm_bytes, store_bytes, budget)
    n_tiles = n_rows // tm

    wxa_flat, wxz_flat, stats = pl.pallas_call(
        _make_proj_kernel(hidden, store_dtype),
        out_shape=(jax.ShapeDtypeStruct((n_rows, hidden), store_dtype),
                   jax.ShapeDtypeStruct((n_rows, hidden), store_dtype),
                   jax.ShapeDtypeStruct((n_tiles, 2, h2), jnp.float32)),
        grid_spec=pltpu.PrefetchScalarGridSpec(
            num_scalar_prefetch=0,
            grid=(n_tiles,),
            in_specs=[
                pl.BlockSpec((tm, F), lambda i: (i, 0)),     # row tile of x
                pl.BlockSpec((F, h2), lambda i: (0, 0)),     # full W.T, resident
            ],
            out_specs=(
                pl.BlockSpec((tm, hidden), lambda i: (i, 0)),   # a-gate projection
                pl.BlockSpec((tm, hidden), lambda i: (i, 0)),   # z-gate projection
                pl.BlockSpec((1, 2, h2), lambda i: (i, 0, 0)),  # per-tile moments
            ),
        ),
        compiler_params=pltpu.CompilerParams(
            dimension_semantics=("parallel",),       # independent tiles
            vmem_limit_bytes=vmem_limit,
        ),
    )(x_flat, wt)

    bn = _finalize_bn(stats, n_true, hidden)         # (4, H) f32, tiny XLA combine

    wxa = wxa_flat.reshape(t_pad, B, hidden)         # free reshapes, no transpose
    wxz = wxz_flat.reshape(t_pad, B, hidden)
    uta = jnp.transpose(U[:hidden, :]).astype(matmul_dtype)   # (H, H) = Ua.T
    utz = jnp.transpose(U[hidden:, :]).astype(matmul_dtype)   # (H, H) = Uz.T

    h_seq = pl.pallas_call(
        _make_recurrence_kernel(matmul_dtype, max(1, min(4, tc))),
        out_shape=jax.ShapeDtypeStruct((t_pad, B, hidden), jnp.float32),
        grid_spec=pltpu.PrefetchScalarGridSpec(
            num_scalar_prefetch=0,
            grid=(t_pad // tc,),
            in_specs=[
                pl.BlockSpec((tc, B, hidden), lambda c: (c, 0, 0)),   # wx (a)
                pl.BlockSpec((tc, B, hidden), lambda c: (c, 0, 0)),   # wx (z)
                pl.BlockSpec((hidden, hidden), lambda c: (0, 0)),     # Ua.T resident
                pl.BlockSpec((hidden, hidden), lambda c: (0, 0)),     # Uz.T resident
                pl.BlockSpec((4, hidden), lambda c: (0, 0)),          # BN params
            ],
            out_specs=pl.BlockSpec((tc, B, hidden), lambda c: (c, 0, 0)),
            scratch_shapes=[pltpu.VMEM((B, hidden), jnp.float32)],    # h carry
        ),
        compiler_params=pltpu.CompilerParams(
            dimension_semantics=("arbitrary",),      # sequential time chunks
            vmem_limit_bytes=vmem_limit,
        ),
    )(wxa, wxz, uta, utz, bn)

    return h_seq[:T] if t_pad != T else h_seq


# ---------------------------------------------------------------------------
# Full SLiGRU forward (stack of layers).
# ---------------------------------------------------------------------------
def sligru_forward(x, params, *, matmul_dtype=jnp.bfloat16,
                   row_tile=None, time_chunk=None):
    """x: (B, T, F).  params: list of (W, U) per layer.
    Returns (output (B, T, H), hh (num_layers, B, H)) like the PyTorch module."""
    out = jnp.transpose(x, (1, 0, 2))        # (T, B, F): single up-front transpose
    last_states = []
    for (W, U) in params:
        out = sligru_layer(out, W, U, matmul_dtype=matmul_dtype,
                           row_tile=row_tile, time_chunk=time_chunk)
        last_states.append(out[-1])          # (B, H) last time step of this layer
    output = jnp.transpose(out, (1, 0, 2))   # back to (B, T, H) once at the end
    hh = jnp.stack(last_states, axis=0)      # (num_layers, B, H)
    return output, hh


def init_params(key, input_dim, hidden_size, num_layers):
    """Parameter init mirroring the PyTorch module's shapes:
       W (w.weight): (2H, in_dim);  U (u.weight): (2H, H) orthogonal."""
    params = []
    cur = input_dim
    for _ in range(num_layers):
        kw, ku, key = jax.random.split(key, 3)
        W = jax.random.uniform(
            kw, (2 * hidden_size, cur), dtype=jnp.float32,
            minval=-1.0, maxval=1.0) / jnp.sqrt(jnp.float32(cur))
        U = jax.nn.initializers.orthogonal()(ku, (2 * hidden_size, hidden_size),
                                             jnp.float32)
        params.append((W, U))
        cur = hidden_size
    return params


# ---------------------------------------------------------------------------
# Pure-JAX reference (mirrors LiGRU_Layer._ligru_cell_cpu + BatchNorm1d).
# ---------------------------------------------------------------------------
def _sligru_reference(x, params):
    out = x
    last = []
    for (W, U) in params:
        b, t, _ = out.shape
        hidden = U.shape[1]
        w = jnp.einsum("btf,gf->btg", out, W, precision=lax.Precision.HIGHEST)
        wf = w.reshape(b * t, -1)
        mean = jnp.mean(wf, axis=0)
        var = jnp.mean((wf - mean) ** 2, axis=0)
        w = ((wf - mean) * lax.rsqrt(var + EPS)).reshape(b, t, -1)
        h = jnp.zeros((b, hidden), jnp.float32)
        hs = []
        for k in range(t):
            uh = jnp.dot(h, U.T, precision=lax.Precision.HIGHEST)
            mu = jnp.mean(uh, axis=-1, keepdims=True)
            v = jnp.mean((uh - mu) ** 2, axis=-1, keepdims=True)
            gates = w[:, k] + (uh - mu) * lax.rsqrt(v + EPS)
            at, zt = gates[:, :hidden], jax.nn.sigmoid(gates[:, hidden:])
            h = zt * h + (1.0 - zt) * jnp.maximum(at, 0.0)
            hs.append(h)
        out = jnp.stack(hs, axis=1)
        last.append(h)
    return out, jnp.stack(last, axis=0)


if __name__ == "__main__":
    key = jax.random.PRNGKey(0)

    # --- config 1: tiny, exact f32 path ------------------------------------
    B, T, F, H, L = 2, 8, 16, 32, 1
    kx, kp, key = jax.random.split(key, 3)
    x = jax.random.normal(kx, (B, T, F), dtype=jnp.float32)
    params = init_params(kp, F, H, L)
    out, hh = sligru_forward(x, params, matmul_dtype=jnp.float32)
    jax.block_until_ready((out, hh))
    assert out.shape == (B, T, H) and hh.shape == (L, B, H)
    out_ref, hh_ref = _sligru_reference(x, params)
    assert jnp.allclose(out, out_ref, atol=2e-3, rtol=2e-3), \
        float(jnp.max(jnp.abs(out - out_ref)))
    assert jnp.allclose(hh, hh_ref, atol=2e-3, rtol=2e-3)

    # --- config 2: ragged T (time padding), multi-tile BN stats, 2 layers ---
    B, T, F, H, L = 4, 10, 24, 64, 2
    kx, kp, key = jax.random.split(key, 3)
    x = jax.random.normal(kx, (B, T, F), dtype=jnp.float32)
    params = init_params(kp, F, H, L)
    out, hh = sligru_forward(x, params, matmul_dtype=jnp.float32,
                             time_chunk=4, row_tile=16)
    jax.block_until_ready((out, hh))
    assert out.shape == (B, T, H) and hh.shape == (L, B, H)
    out_ref, hh_ref = _sligru_reference(x, params)
    assert jnp.allclose(out, out_ref, atol=2e-3, rtol=2e-3), \
        float(jnp.max(jnp.abs(out - out_ref)))
    assert jnp.allclose(hh, hh_ref, atol=2e-3, rtol=2e-3)

    # --- config 3: default bf16 fast path (bf16 MXU operands + bf16 wx) -----
    B, T, F, H, L = 4, 10, 24, 64, 1
    kx, kp, key = jax.random.split(key, 3)
    x = jax.random.normal(kx, (B, T, F), dtype=jnp.float32)
    params = init_params(kp, F, H, L)
    out, hh = sligru_forward(x, params)          # default matmul_dtype=bf16
    jax.block_until_ready((out, hh))
    assert out.shape == (B, T, H) and hh.shape == (L, B, H)
    assert jnp.all(jnp.isfinite(out)) and jnp.all(jnp.isfinite(hh))
    out_ref, hh_ref = _sligru_reference(x, params)
    assert jnp.allclose(out, out_ref, atol=6e-2, rtol=6e-2), \
        float(jnp.max(jnp.abs(out - out_ref)))
    assert jnp.allclose(hh, hh_ref, atol=6e-2, rtol=6e-2)

    print("KERNEL_OK")
</pallas_src>

<mosaic_0001>
module attributes {stable_mosaic.version = 11 : i64} {
  func.func @kernel(%arg0: i32, %arg1: memref<16x16xf32, #tpu.memory_space<vmem>>, %arg2: memref<16x64xf32, #tpu.memory_space<vmem>>, %arg3: memref<16x32xf32, #tpu.memory_space<vmem>>, %arg4: memref<16x32xf32, #tpu.memory_space<vmem>>, %arg5: memref<1x2x64xf32, #tpu.memory_space<vmem>>) attributes {dimension_semantics = [#tpu.dimension_semantics<parallel>], iteration_bounds = array<i64: 1>, scalar_prefetch = 0 : i64, scratch_operands = 0 : i64, tpu.core_type = #tpu.core_type<tc>, window_params = [{transform_indices = @transform_0, window_bounds = array<i64: 16, 16>}, {pipeline_mode = #tpu.pipeline_mode<synchronous>, transform_indices = @transform_1, window_bounds = array<i64: 16, 64>}, {transform_indices = @transform_2, window_bounds = array<i64: 16, 32>}, {transform_indices = @transform_3, window_bounds = array<i64: 16, 32>}, {transform_indices = @transform_4, window_bounds = array<i64: 1, 2, 64>}]} {
    %c0 = arith.constant 0 : index
    %c0_0 = arith.constant 0 : index
    %0 = vector.load %arg1[%c0, %c0_0] : memref<16x16xf32, #tpu.memory_space<vmem>>, vector<16x16xf32>
    %c0_1 = arith.constant 0 : index
    %c0_2 = arith.constant 0 : index
    %1 = vector.load %arg2[%c0_1, %c0_2] : memref<16x64xf32, #tpu.memory_space<vmem>>, vector<16x64xf32>
    %cst = arith.constant dense<0.000000e+00> : vector<16x64xf32>
    %2 = tpu.matmul %0, %1, %cst {dimension_numbers = #tpu.dot_dimension_numbers<[1], [0], [0], [1], [0, 0, 1, 1], [], []>} : vector<16x16xf32>, vector<16x64xf32>, vector<16x64xf32> -> vector<16x64xf32>
    %3 = vector.extract_strided_slice %2 {offsets = [0, 0], sizes = [16, 32], strides = [1, 1]} : vector<16x64xf32> to vector<16x32xf32>
    %c0_3 = arith.constant 0 : index
    %c0_4 = arith.constant 0 : index
    %4 = vector.load %arg3[%c0_3, %c0_4] : memref<16x32xf32, #tpu.memory_space<vmem>>, vector<16x32xf32>
    tpu.vector_store %arg3[%c0_3, %c0_4], %3 {strides = array<i32>} : memref<16x32xf32, #tpu.memory_space<vmem>>, vector<16x32xf32>,
    %5 = vector.extract_strided_slice %2 {offsets = [0, 32], sizes = [16, 32], strides = [1, 1]} : vector<16x64xf32> to vector<16x32xf32>
    %c0_5 = arith.constant 0 : index
    %c0_6 = arith.constant 0 : index
    %6 = vector.load %arg4[%c0_5, %c0_6] : memref<16x32xf32, #tpu.memory_space<vmem>>, vector<16x32xf32>
    tpu.vector_store %arg4[%c0_5, %c0_6], %5 {strides = array<i32>} : memref<16x32xf32, #tpu.memory_space<vmem>>, vector<16x32xf32>,
    %cst_7 = arith.constant dense<0.000000e+00> : vector<64xf32>
    %7 = vector.multi_reduction <add>, %2, %cst_7 [0] : vector<16x64xf32> to vector<64xf32>
    %8 = vector.shape_cast %7 : vector<64xf32> to vector<1x64xf32>
    %9 = arith.mulf %2, %2 : vector<16x64xf32>
    %cst_8 = arith.constant dense<0.000000e+00> : vector<64xf32>
    %10 = vector.multi_reduction <add>, %9, %cst_8 [0] : vector<16x64xf32> to vector<64xf32>
    %11 = vector.shape_cast %10 : vector<64xf32> to vector<1x64xf32>
    %12 = tpu.concatenate %8, %11 in 0 : vector<1x64xf32>, vector<1x64xf32> -> vector<2x64xf32>
    %13 = vector.shape_cast %12 : vector<2x64xf32> to vector<1x2x64xf32>
    %c0_9 = arith.constant 0 : index
    %c0_10 = arith.constant 0 : index
    %c0_11 = arith.constant 0 : index
    %14 = vector.load %arg5[%c0_9, %c0_10, %c0_11] : memref<1x2x64xf32, #tpu.memory_space<vmem>>, vector<1x2x64xf32>
    tpu.vector_store %arg5[%c0_9, %c0_10, %c0_11], %13 {strides = array<i32>} : memref<1x2x64xf32, #tpu.memory_space<vmem>>, vector<1x2x64xf32>,
    return
  }
  func.func @transform_0(%arg0: i32) -> (i32, i32) {
    %c0_i32 = arith.constant 0 : i32
    %c0_i32_0 = arith.constant 0 : i32
    return %arg0, %c0_i32 : i32, i32
  }
  func.func @transform_1(%arg0: i32) -> (i32, i32) {
    %c0_i32 = arith.constant 0 : i32
    %c0_i32_0 = arith.constant 0 : i32
    %c0_i32_1 = arith.constant 0 : i32
    return %c0_i32, %c0_i32_0 : i32, i32
  }
  func.func @transform_2(%arg0: i32) -> (i32, i32) {
    %c0_i32 = arith.constant 0 : i32
    %c0_i32_0 = arith.constant 0 : i32
    return %arg0, %c0_i32 : i32, i32
  }
  func.func @transform_3(%arg0: i32) -> (i32, i32) {
    %c0_i32 = arith.constant 0 : i32
    %c0_i32_0 = arith.constant 0 : i32
    return %arg0, %c0_i32 : i32, i32
  }
  func.func @transform_4(%arg0: i32) -> (i32, i32, i32) {
    %c0_i32 = arith.constant 0 : i32
    %c0_i32_0 = arith.constant 0 : i32
    %c0_i32_1 = arith.constant 0 : i32
    return %arg0, %c0_i32, %c0_i32_0 : i32, i32, i32
  }
}

</mosaic_0001>

<bundles_post_ra>
// kernel: tpu_custom_call.1
= control target key start
LH: loop header
LB: loop body
LE: loop exit
PB: predicated region body
PF: predicated region fallthrough
CT: control target
= control target key end

     0   :  { %10 = vsyncpa [#allocation3], 0  ;;  %s471_s0 = inlined_call_operand.hbm [shape: f32[16,16], index: 0, kind: input, shape index: {}]   ;;  %s472_s1 = inlined_call_operand.hbm [shape: f32[16,64], index: 1, kind: input, shape index: {}]   ;;  %s473_s2 = inlined_call_operand.hbm [shape: f32[16,32], index: 2, kind: output, shape index: {0}]   ;;  %s474_s3 = inlined_call_operand.hbm [shape: f32[16,32], index: 3, kind: output, shape index: {1}]   ;;  %s475_s4 = inlined_call_operand.hbm [shape: f32[1,2,64], index: 4, kind: output, shape index: {2}]  }
   0x1   :  { %11 = vsyncpa [#allocation6], 0 }
   0x2   :  { %12 = vsyncpa [#allocation4], 0 }
   0x3   :  { %13 = vsyncpa [#allocation9], 0  ;;  %s358_s15 = smov [#allocation2]   ;;  %s240_s19 = scalar_lea.hbm %s471_s0, 256 }
   0x4   :  { %s19_s16 = sshll.u32 %s358_s15, 4  ;;  %p241_p0 = scmp.ne.s32.totalorder %s471_s0, %s240_s19  ;;  %s20_s16 = int_to_ptr.vmem [resolvable:$true] %s19_s16 }
   0x5   :  { %p244_p1 = scmp.lt.u32.totalorder %s240_s19, %s471_s0 }
   0x7   :  { %p246_p2 = pnand %p244_p1, %p241_p0 }
   0x9   :  { %249 = shalt.err (!%p246_p2)
}
   0xa   :  { %s250_s24 = scalar_lea.vmem %s20_s16, 256  ;;  %p255_p4 = scmp.lt.s32.totalorder %s20_s16, %s20_s16 }
   0xb   :  { %p251_p3 = scmp.ne.s32.totalorder %s20_s16, %s250_s24  ;;  %p256_p5 = scmp.lt.s32.totalorder %s250_s24, %s250_s24 }
   0xd   :  { %p257_p6 = por %p256_p5, %p255_p4 }
   0xf   :  { %p258_p7 = pnand %p257_p6, %p251_p3 }
  0x11   :  { %261 = shalt.err (!%p258_p7)
}
  0x12   :  { %s359_s25 = smov 128   ;;  %s360_s26 = smov 8  }
  0x13   :  { %25 = dma.hbm_to_vmem [thread:$0]  %s471_s0, 256, %s20_s16, [#allocation3], %s359_s25, %s359_s25, %s360_s26  }
  0x14   :  { %s361_s29 = smov [#allocation5]   ;;  %s262_s7 = scalar_lea.hbm %s472_s1, 256 }
  0x15   :  { %s31_s30 = sshll.u32 %s361_s29, 4  ;;  %p263_p8 = scmp.ne.s32.totalorder %s472_s1, %s262_s7  ;;  %s32_s30 = int_to_ptr.vmem [resolvable:$true] %s31_s30 }
  0x16   :  { %p266_p9 = scmp.lt.u32.totalorder %s262_s7, %s472_s1 }
  0x18   :  { %p268_p10 = pnand %p266_p9, %p263_p8 }
  0x1a   :  { %271 = shalt.err (!%p268_p10)
}
  0x1b   :  { %s272_s12 = scalar_lea.vmem %s32_s30, 256  ;;  %p277_p12 = scmp.lt.s32.totalorder %s32_s30, %s32_s30 }
  0x1c   :  { %p273_p11 = scmp.ne.s32.totalorder %s32_s30, %s272_s12  ;;  %p278_p13 = scmp.lt.s32.totalorder %s272_s12, %s272_s12 }
  0x1e   :  { %p279_p0 = por %p278_p13, %p277_p12 }
  0x20   :  { %p280_p1 = pnand %p279_p0, %p273_p11 }
  0x22   :  { %283 = shalt.err (!%p280_p1)
}
  0x23   :  { %37 = dma.hbm_to_vmem [thread:$0]  %s472_s1, 256, %s32_s30, [#allocation6], %s359_s25, %s359_s25, %s360_s26  }
  0x24   :  { %350 = dma.done.wait [#allocation3], 256  }
  0x25   :  { %351 = vsyncadd [#allocation3], 4294967040 }
  0x26   :  { %352 = dma.done.wait [#allocation6], 256  }
  0x27   :  { %353 = vsyncadd [#allocation6], 4294967040  ;;  %vm48_vm0 = vcmask 130048   ;;  %v46_v0 = vld [vmem:[#allocation5] sm:$0xff]  ;;  %v47_v1 = vld [vmem:[#allocation5 + $0x8] sm:$0xff]  ;;  %s362_s14 = smov [#allocation7]  }
  0x28   :  { %v44_v2 = vld [vmem:[#allocation2] sm:$0xff]  ;;  %v228_v3 = vpack.c.bf16 %v47_v1, %v46_v0  ;;  %v45_v4 = vld [vmem:[#allocation2 + $0x8] sm:$0xff]  ;;  %s173_s15 = sshll.u32 %s362_s14, 4  ;;  %vm143_vm1 = vcmask 523264   ;;  %vm130_vm2 = vcmask 261120   ;;  %s363_s1 = smov 96   ;;  %s174_s15 = int_to_ptr.vmem [resolvable:$true] %s173_s15 }
  0x29   :  { %225 = vmatprep.mubr.msk.f32.mxu0 %vm48_vm0, %v44_v2  ;;  %s284_s16 = scalar_lea.vmem %s174_s15, 256  ;;  %p289_p3 = scmp.lt.s32.totalorder %s174_s15, %s174_s15 }
  0x2a   :  { %229 = vmatprep.subr.bf16.mxu0 %v228_v3  ;;  %p285_p2 = scmp.ne.s32.totalorder %s174_s15, %s284_s16  ;;  %p290_p4 = scmp.lt.s32.totalorder %s284_s16, %s284_s16 }
  0x2b   :  { %231 = vmatpush3.bf16.msra.mxu0 %v228_v3 }
  0x2c   :  { %p291_p5 = por %p290_p4, %p289_p3 }
  0x2e   :  { %226 = vmatmul.mubr.msk.f32.vlgmr.msra.gmra.mrb[0].mxu0 %vm48_vm0, %v45_v4  ;;  %p292_p6 = pnand %p291_p5, %p285_p2 }
 0x101   :  { %v227_v5 = vpop.f32.mrb[0].mxu0 }
 0x102   :  { %v154_v6 = vmul.f32 %v227_v5, %v227_v5  ;;  %v121_v7 = vpop.f32.mrb[1].mxu0  ;;  %v145_v8 = vsel %vm143_vm1, %v227_v5, 0.0  ;;  %132 = vst.msk [vmem:[#allocation7 + $0x8] sm:$0xff] %vm130_vm2, %v227_v5 }
 0x103   :  { %v144_v9 = vsel %vm143_vm1, %v121_v7, 0.0  ;;  %v153_v10 = vmul.f32 %v121_v7, %v121_v7  ;;  %135 = vrot.lane.b32.xlu0 %v121_v7, %s363_s1  ;;  %131 = vst.msk [vmem:[#allocation7] sm:$0xff] %vm130_vm2, %v121_v7 }
 0x104   :  { %v146_v11 = vadd.f32 %v145_v8, %v144_v9  ;;  %v156_v12 = vsel %vm143_vm1, %v154_v6, 0.0 }
 0x105   :  { %295 = shalt.err (!%p292_p6)
}
 0x106   :  { %s296_s19 = scalar_lea.hbm %s473_s2, 256 }
 0x107   :  { %p297_p7 = scmp.ne.s32.totalorder %s473_s2, %s296_s19  ;;  %p300_p8 = scmp.lt.u32.totalorder %s296_s19, %s473_s2 }
 0x109   :  { %p302_p9 = pnand %p300_p8, %p297_p7 }
 0x10b   :  { %305 = shalt.err (!%p302_p9)
}
 0x10c   :  { %179 = dma.vmem_to_hbm [thread:$0]  %s174_s15, 256, %s473_s2, [#allocation4], %s359_s25, %s359_s25, %s360_s26   ;;  %v155_v13 = vsel %vm143_vm1, %v153_v10, 0.0  ;;  %v147_v14 = vrot.slane %v146_v11, 4  ;;  %vm164_vm3 = vcmask 1040384   ;;  %vm166_vm4 = vcmask 517120  }
 0x10d   :  { %v157_v15 = vadd.f32 %v156_v12, %v155_v13  ;;  %137 = vrot.lane.b32.xlu0 %v227_v5, %s363_s1  ;;  %s364_s2 = smov [#allocation8]   ;;  %s365_s29 = smov [#allocation10]  }
 0x10e   :  { %v148_v16 = vadd.f32 %v147_v14, %v146_v11  ;;  %s185_s28 = sshll.u32 %s364_s2, 4  ;;  %s198_s30 = sshll.u32 %s365_s29, 4  ;;  %s186_s28 = int_to_ptr.vmem [resolvable:$true] %s185_s28  ;;  %s199_s30 = int_to_ptr.vmem [resolvable:$true] %s198_s30 }
 0x10f   :  { %v158_v17 = vrot.slane %v157_v15, 4  ;;  %s306_s5 = scalar_lea.vmem %s186_s28, 256  ;;  %p311_p11 = scmp.lt.s32.totalorder %s186_s28, %s186_s28 }
 0x110   :  { %v149_v18 = vrot.slane %v148_v16, 2  ;;  %p307_p10 = scmp.ne.s32.totalorder %s186_s28, %s306_s5  ;;  %p312_p12 = scmp.lt.s32.totalorder %s306_s5, %s306_s5 }
 0x111   :  { %v159_v19 = vadd.f32 %v158_v17, %v157_v15 }
 0x112   :  { %v150_v20 = vadd.f32 %v149_v18, %v148_v16  ;;  %p313_p13 = por %p312_p12, %p311_p11 }
 0x113   :  { %v160_v21 = vrot.slane %v159_v19, 2 }
 0x114   :  { %v151_v22 = vrot.slane %v150_v20, 1  ;;  %p314_p0 = pnand %p313_p13, %p307_p10 }
 0x115   :  { %v161_v23 = vadd.f32 %v160_v21, %v159_v19 }
 0x116   :  { %v152_v25 = vadd.f32 %v151_v22, %v150_v20 }
 0x117   :  { %v162_v24 = vrot.slane %v161_v23, 1 }
 0x119   :  { %v163_v26 = vadd.f32 %v162_v24, %v161_v23 }
 0x11b   :  { %v165_v27 = vsel %vm164_vm3, %v152_v25, %v163_v26 }
 0x11c   :  { %167 = vst.msk [vmem:[#allocation10] sm:$0x3] %vm166_vm4, %v165_v27 }
 0x175   :  { %v136_v28 = vpop.permute.xlu0 %135 }
 0x176   :  { %141 = vst.msk [vmem:[#allocation8] sm:$0xff] %vm130_vm2, %v136_v28 }
 0x17f   :  { %v138_v29 = vpop.permute.xlu0 %137 }
 0x180   :  { %142 = vst.msk [vmem:[#allocation8 + $0x8] sm:$0xff] %vm130_vm2, %v138_v29 }
 0x181   :  { %317 = shalt.err (!%p314_p0)
}
 0x182   :  { %s318_s8 = scalar_lea.hbm %s474_s3, 256 }
 0x183   :  { %p319_p1 = scmp.ne.s32.totalorder %s474_s3, %s318_s8  ;;  %p322_p2 = scmp.lt.u32.totalorder %s318_s8, %s474_s3 }
 0x185   :  { %p324_p3 = pnand %p322_p2, %p319_p1 }
 0x187   :  { %327 = shalt.err (!%p324_p3)
}
 0x188   :  { %191 = dma.vmem_to_hbm [thread:$0]  %s186_s28, 256, %s474_s3, [#allocation9], %s359_s25, %s359_s25, %s360_s26  }
 0x189   :  { %s328_s14 = scalar_lea.vmem %s199_s30, 32  ;;  %p333_p5 = scmp.lt.s32.totalorder %s199_s30, %s199_s30 }
 0x18a   :  { %p329_p4 = scmp.ne.s32.totalorder %s199_s30, %s328_s14  ;;  %p334_p6 = scmp.lt.s32.totalorder %s328_s14, %s328_s14 }
 0x18c   :  { %p335_p7 = por %p334_p6, %p333_p5 }
 0x18e   :  { %p336_p8 = pnand %p335_p7, %p329_p4 }
 0x190   :  { %339 = shalt.err (!%p336_p8)
}
 0x191   :  { %s340_s16 = scalar_lea.hbm %s475_s4, 32 }
 0x192   :  { %p341_p9 = scmp.ne.s32.totalorder %s475_s4, %s340_s16  ;;  %p344_p10 = scmp.lt.u32.totalorder %s340_s16, %s475_s4 }
 0x194   :  { %p346_p11 = pnand %p344_p10, %p341_p9 }
 0x196   :  { %349 = shalt.err (!%p346_p11)
}
 0x197   :  { %201 = dma.vmem_to_hbm [thread:$0]  %s199_s30, 32, %s475_s4, [#allocation9]  }
 0x198   :  { %354 = dma.done.wait [#allocation4], 256  }
 0x199   :  { %355 = vsyncadd [#allocation4], 4294967040 }
 0x19a   :  { %356 = dma.done.wait [#allocation9], 288  }
 0x19b   :  { %357 = vsyncadd [#allocation9], 4294967008 }
 0x19c   :  { %211 = vsyncpa [#allocation3], 1 }
 0x19d   :  { %212 = vsyncpa [#allocation6], 1 }
 0x19e   :  { %213 = vsyncpa [#allocation4], 1 }
 0x19f   :  { %214 = vsyncpa [#allocation9], 1 }

</bundles_post_ra>
